<compile_context>
chip_gen: v7x
topology: tpu7x:2x2x1
jax: 0.10.0
libtpu: 0.0.40
codegen_flags: <defaults>
</compile_context>

<pallas_src>
import jax
import jax.numpy as jnp
from jax import lax
from jax.experimental import pallas as pl
from jax.experimental.pallas import tpu as pltpu


def _round_up(n, m):
    return ((n + m - 1) // m) * m


def _default_pool_dtype():
    """bf16 max on v6e/v7x (bf16 VALU, exact for max); f32 on v5e and older."""
    try:
        kind = jax.devices()[0].device_kind.lower()
    except Exception:
        return jnp.float32
    if "tpu" not in kind:
        return jnp.float32
    for old in ("v2", "v3", "v4", "v5"):
        if old in kind:
            return jnp.float32
    return jnp.bfloat16


def _make_kernel(L_true, TLf, F, C, needs_mask, acc_dtype):
    """Build the kernel with all static shape parameters closed over."""
    full_rows = L_true // F            # folded rows that are entirely valid
    rem_lanes = (L_true % F) * C       # valid lanes in the (single) boundary row
    neg_inf = float("-inf")

    def kernel(x_ref, w1_ref, b1_ref, w2_ref, b2_ref, o_ref, pooled_acc):
        l = pl.program_id(1)

        # ---- init the running max at the start of each sequence sweep ------
        @pl.when(l == 0)
        def _init():
            pooled_acc[...] = jnp.full_like(pooled_acc, neg_inf)

        # ---- streamed global max-pool over the (folded) sequence axis ------
        x = x_ref[...]                                    # (TB, TLf, F*C) bf16
        if needs_mask:
            # Mask positions past the true sequence length.  Covers both the
            # fold remainder and a partial last seq tile (OOB reads of the
            # tail block are garbage but always masked to -inf here).
            row = lax.broadcasted_iota(jnp.int32, x.shape, 1) + l * TLf
            valid = row < full_rows
            if rem_lanes:
                lane = lax.broadcasted_iota(jnp.int32, x.shape, 2)
                valid = valid | ((row == full_rows) & (lane < rem_lanes))
            x = jnp.where(valid, x, jnp.asarray(neg_inf, x.dtype))
        x = x.astype(acc_dtype)          # no-op when the max runs in bf16
        pooled_acc[...] = jnp.maximum(pooled_acc[...], jnp.max(x, axis=1))

        # ---- epilogue: fold + fc1 -> ReLU -> fc2, once per batch tile -------
        @pl.when(l == pl.num_programs(1) - 1)
        def _epilogue():
            # F-way fold of the lane-packed accumulator back to (TB, C).
            pooled = pooled_acc[:, 0:C].astype(jnp.float32)
            for f in range(1, F):
                pooled = jnp.maximum(
                    pooled, pooled_acc[:, f * C:(f + 1) * C].astype(jnp.float32))
            h = jnp.dot(pooled.astype(jnp.bfloat16), w1_ref[...],
                        preferred_element_type=jnp.float32) + b1_ref[...]
            h = jnp.maximum(h, 0.0)                       # ReLU (f32)
            out = jnp.dot(h.astype(jnp.bfloat16), w2_ref[...],
                          preferred_element_type=jnp.float32) + b2_ref[...]
            o_ref[...] = out.astype(o_ref.dtype)          # lane-dense store

    return kernel


def mlp_classifier_forward(x, w1, b1, w2, b2, *, block_b=128, block_l=2048,
                           pool_dtype=None):
    """
    x : (B, L, C)          -- same layout PyTorch receives before permute
    w1: (H, C), b1: (H,)   -- fc1 (PyTorch Linear convention: (out, in))
    w2: (K, H), b2: (K,)   -- fc2
    returns (B, K) float32
    """
    B, L, C = x.shape
    H = w1.shape[0]
    K = w2.shape[0]

    if pool_dtype is None:
        pool_dtype = _default_pool_dtype()

    # ---- lane-density fold: F sequence positions share one ~128-lane row ----
    F = max(1, 128 // C)
    FC = F * C
    L_pf = _round_up(L, F)            # positions after fold alignment
    Lf = L_pf // F                    # folded sequence length

    # ---- batch tiling (ensure >= 2 tiles when possible: v7x megacore) -------
    B8 = _round_up(B, 8)
    TB = min(_round_up(block_b, 8), B8)
    if B8 // TB < 2 and B8 >= 16:
        TB = min(_round_up(max(8, B8 // 2), 8), B8)
    B_pad = _round_up(B, TB)

    # ---- folded-seq tiling, capped so the double-buffered x stream fits -----
    TLf = max(1, block_l // F)
    budget = 32 << 20                 # x double-buffer budget (v7x: 64 MiB/TC)
    while 2 * TB * TLf * FC * 2 > budget and TLf > 8:
        TLf = max(8, TLf // 2)
    if TLf >= Lf or Lf <= 8:
        TLf = Lf                      # single tile; block dim == full dim is OK
    else:
        TLf = max(8, (TLf // 8) * 8)  # keep the sublane dim a multiple of 8
    num_b = B_pad // TB
    num_l = -(-Lf // TLf)

    needs_mask = (L_pf != L) or (num_l * TLf != Lf)

    Hp = _round_up(H, 128)            # lane-dense fc1 output width
    Kp = _round_up(K, 128)            # lane-dense fc2 / kernel output width

    # ---- input prep: cast to bf16 FIRST, one zero pad only if needed --------
    x_b = jnp.asarray(x)
    if x_b.dtype != jnp.bfloat16:
        x_b = x_b.astype(jnp.bfloat16)
    pad_b, pad_l = B_pad - B, L_pf - L
    if pad_b or pad_l:
        # Zero padding: padded seq positions are masked to -inf in-kernel,
        # padded batch rows are sliced off below.
        x_b = jnp.pad(x_b, ((0, pad_b), (0, pad_l), (0, 0)))
    x_b = x_b.reshape(B_pad, Lf, FC)  # free: the (L, C) rows are contiguous

    # ---- weights: (in, out), zero-padded to lane-dense widths, bf16 ---------
    w1_t = jnp.zeros((C, Hp), jnp.bfloat16).at[:, :H].set(
        jnp.asarray(w1, jnp.float32).T.astype(jnp.bfloat16))
    w2_t = jnp.zeros((Hp, Kp), jnp.bfloat16).at[:H, :K].set(
        jnp.asarray(w2, jnp.float32).T.astype(jnp.bfloat16))
    b1_r = jnp.zeros((1, Hp), jnp.float32).at[:, :H].set(
        jnp.asarray(b1, jnp.float32).reshape(1, H))
    b2_r = jnp.zeros((1, Kp), jnp.float32).at[:, :K].set(
        jnp.asarray(b2, jnp.float32).reshape(1, K))

    kernel = _make_kernel(L, TLf, F, C, needs_mask, pool_dtype)

    # Explicit VMEM budget (v5e's default scoped limit is only 16 MiB).
    vmem_limit = (2 * TB * TLf * FC * 2           # x double buffer (bf16)
                  + 2 * (C * Hp + Hp * Kp) * 2    # weights (bf16, 2 buffers)
                  + 2 * (Hp + Kp) * 4             # biases
                  + 2 * TB * Kp * 4               # output tile
                  + TB * FC * 4                   # pooled accumulator
                  + (4 << 20))                    # compiler scratch headroom
    vmem_limit = max(int(vmem_limit), 32 << 20)   # stays < v7x's 64 MiB/TC

    out_padded = pl.pallas_call(
        kernel,
        out_shape=jax.ShapeDtypeStruct((B_pad, Kp), jnp.float32),
        grid=(num_b, num_l),
        in_specs=[
            # x streams over both grid axes, lane-dense last dim.
            pl.BlockSpec((TB, TLf, FC), lambda b, l: (b, l, 0)),
            # Weights / biases: constant block index -> resident in VMEM.
            pl.BlockSpec((C, Hp), lambda b, l: (0, 0)),
            pl.BlockSpec((1, Hp), lambda b, l: (0, 0)),
            pl.BlockSpec((Hp, Kp), lambda b, l: (0, 0)),
            pl.BlockSpec((1, Kp), lambda b, l: (0, 0)),
        ],
        out_specs=pl.BlockSpec((TB, Kp), lambda b, l: (b, 0)),
        scratch_shapes=[pltpu.VMEM((TB, FC), pool_dtype)],
        compiler_params=pltpu.CompilerParams(
            # Batch tiles are independent (megacore-shardable on v7x); the
            # sequence axis is a running-max reduction -> "arbitrary", last.
            dimension_semantics=("parallel", "arbitrary"),
            vmem_limit_bytes=vmem_limit),
    )(x_b, w1_t, b1_r, w2_t, b2_r)

    # Drop batch padding and the zero-padded class columns.
    return out_padded[:B, :K]


def _reference_f32(x, w1, b1, w2, b2):
    pooled = jnp.max(x, axis=1)
    h = jnp.maximum(pooled @ w1.T + b1, 0.0)
    return h @ w2.T + b2


def _reference_matched(x, w1, b1, w2, b2):
    # Same numerics as the kernel: bf16 streamed data + MXU inputs, f32 accum.
    # (The max of bf16 values is exact whether done in bf16 or f32.)
    xb = jnp.asarray(x, jnp.float32).astype(jnp.bfloat16)
    pooled = jnp.max(xb, axis=1).astype(jnp.float32)
    w1b = jnp.asarray(w1, jnp.float32).astype(jnp.bfloat16)
    w2b = jnp.asarray(w2, jnp.float32).astype(jnp.bfloat16)
    h = jnp.dot(pooled.astype(jnp.bfloat16), w1b.T,
                preferred_element_type=jnp.float32) + b1
    h = jnp.maximum(h, 0.0)
    return jnp.dot(h.astype(jnp.bfloat16), w2b.T,
                   preferred_element_type=jnp.float32) + b2


if __name__ == "__main__":
    def run_case(key, B, L, C, H, K, **kw):
        kx, kw1, kb1, kw2, kb2 = jax.random.split(key, 5)
        x = jax.random.normal(kx, (B, L, C), dtype=jnp.float32)
        w1 = jax.random.normal(kw1, (H, C), dtype=jnp.float32) * 0.1
        b1 = jax.random.normal(kb1, (H,), dtype=jnp.float32) * 0.1
        w2 = jax.random.normal(kw2, (K, H), dtype=jnp.float32) * 0.1
        b2 = jax.random.normal(kb2, (K,), dtype=jnp.float32) * 0.1

        out = jax.block_until_ready(
            mlp_classifier_forward(x, w1, b1, w2, b2, **kw))
        assert out.shape == (B, K)

        ref_m = _reference_matched(x, w1, b1, w2, b2)
        assert jnp.allclose(out, ref_m, atol=2e-2, rtol=2e-2), \
            f"mismatch vs bf16-matched reference (B={B}, L={L}, C={C})"
        ref_f = _reference_f32(x, w1, b1, w2, b2)
        assert jnp.allclose(out, ref_f, atol=1e-1, rtol=1e-1), \
            f"mismatch vs f32 reference (B={B}, L={L}, C={C})"

    key = jax.random.PRNGKey(0)
    k1, k2, k3 = jax.random.split(key, 3)

    # Shapes consistent with the module's forward: x (batch, seq, input_size).
    run_case(k1, B=2, L=8, C=32, H=64, K=10)                   # aligned path
    run_case(k2, B=3, L=13, C=32, H=64, K=10)                  # fold-remainder mask
    run_case(k3, B=20, L=200, C=32, H=64, K=10, block_l=64)    # multi-tile seq + partial tail

    print("KERNEL_OK")
</pallas_src>

<mosaic_0001>
module attributes {stable_mosaic.version = 11 : i64} {
  func.func @kernel(%arg0: i32, %arg1: i32, %arg2: memref<8x2x128xbf16, #tpu.memory_space<vmem>>, %arg3: memref<32x128xbf16, #tpu.memory_space<vmem>>, %arg4: memref<1x128xf32, #tpu.memory_space<vmem>>, %arg5: memref<128x128xbf16, #tpu.memory_space<vmem>>, %arg6: memref<1x128xf32, #tpu.memory_space<vmem>>, %arg7: memref<8x128xf32, #tpu.memory_space<vmem>>, %arg8: memref<8x128xf32, #tpu.memory_space<vmem>>) attributes {dimension_semantics = [#tpu.dimension_semantics<parallel>, #tpu.dimension_semantics<arbitrary>], iteration_bounds = array<i64: 1, 1>, scalar_prefetch = 0 : i64, scratch_operands = 1 : i64, tpu.core_type = #tpu.core_type<tc>, window_params = [{transform_indices = @transform_0, window_bounds = array<i64: 8, 2, 128>}, {pipeline_mode = #tpu.pipeline_mode<synchronous>, transform_indices = @transform_1, window_bounds = array<i64: 32, 128>}, {pipeline_mode = #tpu.pipeline_mode<synchronous>, transform_indices = @transform_2, window_bounds = array<i64: 1, 128>}, {pipeline_mode = #tpu.pipeline_mode<synchronous>, transform_indices = @transform_3, window_bounds = array<i64: 128, 128>}, {pipeline_mode = #tpu.pipeline_mode<synchronous>, transform_indices = @transform_4, window_bounds = array<i64: 1, 128>}, {transform_indices = @transform_5, window_bounds = array<i64: 8, 128>}]} {
    %c0_i32 = arith.constant 0 : i32
    %0 = arith.cmpi eq, %arg1, %c0_i32 : i32
    %1 = arith.extui %0 : i1 to i32
    %c0_i32_0 = arith.constant 0 : i32
    %2 = arith.cmpi ne, %1, %c0_i32_0 : i32
    scf.if %2 {
      %cst_9 = arith.constant 0xFF800000 : f32
      %12 = vector.broadcast %cst_9 : f32 to vector<8x128xf32>
      %c0_10 = arith.constant 0 : index
      %c0_11 = arith.constant 0 : index
      %13 = vector.load %arg8[%c0_10, %c0_11] : memref<8x128xf32, #tpu.memory_space<vmem>>, vector<8x128xf32>
      tpu.vector_store %arg8[%c0_10, %c0_11], %12 {strides = array<i32>} : memref<8x128xf32, #tpu.memory_space<vmem>>, vector<8x128xf32>,
    } else {
    }
    %c0 = arith.constant 0 : index
    %c0_1 = arith.constant 0 : index
    %c0_2 = arith.constant 0 : index
    %3 = vector.load %arg2[%c0, %c0_1, %c0_2] : memref<8x2x128xbf16, #tpu.memory_space<vmem>>, vector<8x2x128xbf16>
    %4 = arith.extf %3 : vector<8x2x128xbf16> to vector<8x2x128xf32>
    %c0_3 = arith.constant 0 : index
    %c0_4 = arith.constant 0 : index
    %5 = vector.load %arg8[%c0_3, %c0_4] : memref<8x128xf32, #tpu.memory_space<vmem>>, vector<8x128xf32>
    %cst = arith.constant dense<0xFF800000> : vector<8x128xf32>
    %6 = vector.multi_reduction <maximumf>, %4, %cst [1] : vector<8x2x128xf32> to vector<8x128xf32>
    %7 = arith.maximumf %5, %6 : vector<8x128xf32>
    %c0_5 = arith.constant 0 : index
    %c0_6 = arith.constant 0 : index
    %8 = vector.load %arg8[%c0_5, %c0_6] : memref<8x128xf32, #tpu.memory_space<vmem>>, vector<8x128xf32>
    tpu.vector_store %arg8[%c0_5, %c0_6], %7 {strides = array<i32>} : memref<8x128xf32, #tpu.memory_space<vmem>>, vector<8x128xf32>,
    %c0_i32_7 = arith.constant 0 : i32
    %9 = arith.cmpi eq, %arg1, %c0_i32_7 : i32
    %10 = arith.extui %9 : i1 to i32
    %c0_i32_8 = arith.constant 0 : i32
    %11 = arith.cmpi ne, %10, %c0_i32_8 : i32
    scf.if %11 {
      %c0_9 = arith.constant 0 : index
      %c0_10 = arith.constant 0 : index
      %12 = vector.load %arg8[%c0_9, %c0_10] : memref<8x128xf32, #tpu.memory_space<vmem>>, vector<8x32xf32>
      %c0_11 = arith.constant 0 : index
      %c32 = arith.constant 32 : index
      %13 = vector.load %arg8[%c0_11, %c32] : memref<8x128xf32, #tpu.memory_space<vmem>>, vector<8x32xf32>
      %14 = arith.maximumf %12, %13 : vector<8x32xf32>
      %c0_12 = arith.constant 0 : index
      %c64 = arith.constant 64 : index
      %15 = vector.load %arg8[%c0_12, %c64] : memref<8x128xf32, #tpu.memory_space<vmem>>, vector<8x32xf32>
      %16 = arith.maximumf %14, %15 : vector<8x32xf32>
      %c0_13 = arith.constant 0 : index
      %c96 = arith.constant 96 : index
      %17 = vector.load %arg8[%c0_13, %c96] : memref<8x128xf32, #tpu.memory_space<vmem>>, vector<8x32xf32>
      %18 = arith.maximumf %16, %17 : vector<8x32xf32>
      %19 = arith.truncf %18 : vector<8x32xf32> to vector<8x32xbf16>
      %c0_14 = arith.constant 0 : index
      %c0_15 = arith.constant 0 : index
      %20 = vector.load %arg3[%c0_14, %c0_15] : memref<32x128xbf16, #tpu.memory_space<vmem>>, vector<32x128xbf16>
      %cst_16 = arith.constant dense<0.000000e+00> : vector<8x128xf32>
      %21 = tpu.matmul %19, %20, %cst_16 {dimension_numbers = #tpu.dot_dimension_numbers<[1], [0], [0], [1], [0, 0, 1, 1], [], []>} : vector<8x32xbf16>, vector<32x128xbf16>, vector<8x128xf32> -> vector<8x128xf32>
      %c0_17 = arith.constant 0 : index
      %c0_18 = arith.constant 0 : index
      %22 = vector.load %arg4[%c0_17, %c0_18] : memref<1x128xf32, #tpu.memory_space<vmem>>, vector<1x128xf32>
      %23 = vector.broadcast %22 : vector<1x128xf32> to vector<8x128xf32>
      %24 = arith.addf %21, %23 : vector<8x128xf32>
      %cst_19 = arith.constant 0.000000e+00 : f32
      %25 = vector.broadcast %cst_19 : f32 to vector<8x128xf32>
      %26 = arith.maximumf %24, %25 : vector<8x128xf32>
      %27 = arith.truncf %26 : vector<8x128xf32> to vector<8x128xbf16>
      %c0_20 = arith.constant 0 : index
      %c0_21 = arith.constant 0 : index
      %28 = vector.load %arg5[%c0_20, %c0_21] : memref<128x128xbf16, #tpu.memory_space<vmem>>, vector<128x128xbf16>
      %cst_22 = arith.constant dense<0.000000e+00> : vector<8x128xf32>
      %29 = tpu.matmul %27, %28, %cst_22 {dimension_numbers = #tpu.dot_dimension_numbers<[1], [0], [0], [1], [0, 0, 1, 1], [], []>} : vector<8x128xbf16>, vector<128x128xbf16>, vector<8x128xf32> -> vector<8x128xf32>
      %c0_23 = arith.constant 0 : index
      %c0_24 = arith.constant 0 : index
      %30 = vector.load %arg6[%c0_23, %c0_24] : memref<1x128xf32, #tpu.memory_space<vmem>>, vector<1x128xf32>
      %31 = vector.broadcast %30 : vector<1x128xf32> to vector<8x128xf32>
      %32 = arith.addf %29, %31 : vector<8x128xf32>
      %c0_25 = arith.constant 0 : index
      %c0_26 = arith.constant 0 : index
      %33 = vector.load %arg7[%c0_25, %c0_26] : memref<8x128xf32, #tpu.memory_space<vmem>>, vector<8x128xf32>
      tpu.vector_store %arg7[%c0_25, %c0_26], %32 {strides = array<i32>} : memref<8x128xf32, #tpu.memory_space<vmem>>, vector<8x128xf32>,
    } else {
    }
    return
  }
  func.func @transform_0(%arg0: i32, %arg1: i32) -> (i32, i32, i32) {
    %c0_i32 = arith.constant 0 : i32
    %c0_i32_0 = arith.constant 0 : i32
    return %arg0, %arg1, %c0_i32 : i32, i32, i32
  }
  func.func @transform_1(%arg0: i32, %arg1: i32) -> (i32, i32) {
    %c0_i32 = arith.constant 0 : i32
    %c0_i32_0 = arith.constant 0 : i32
    %c0_i32_1 = arith.constant 0 : i32
    return %c0_i32, %c0_i32_0 : i32, i32
  }
  func.func @transform_2(%arg0: i32, %arg1: i32) -> (i32, i32) {
    %c0_i32 = arith.constant 0 : i32
    %c0_i32_0 = arith.constant 0 : i32
    %c0_i32_1 = arith.constant 0 : i32
    return %c0_i32, %c0_i32_0 : i32, i32
  }
  func.func @transform_3(%arg0: i32, %arg1: i32) -> (i32, i32) {
    %c0_i32 = arith.constant 0 : i32
    %c0_i32_0 = arith.constant 0 : i32
    %c0_i32_1 = arith.constant 0 : i32
    return %c0_i32, %c0_i32_0 : i32, i32
  }
  func.func @transform_4(%arg0: i32, %arg1: i32) -> (i32, i32) {
    %c0_i32 = arith.constant 0 : i32
    %c0_i32_0 = arith.constant 0 : i32
    %c0_i32_1 = arith.constant 0 : i32
    return %c0_i32, %c0_i32_0 : i32, i32
  }
  func.func @transform_5(%arg0: i32, %arg1: i32) -> (i32, i32) {
    %c0_i32 = arith.constant 0 : i32
    %c0_i32_0 = arith.constant 0 : i32
    return %arg0, %c0_i32 : i32, i32
  }
}

</mosaic_0001>

<bundles_post_ra>
// kernel: tpu_custom_call.1
= control target key start
LH: loop header
LB: loop body
LE: loop exit
PB: predicated region body
PF: predicated region fallthrough
CT: control target
= control target key end

     0   :  { %10 = vsyncpa [#allocation4], 0  ;;  %s666_s0 = inlined_call_operand.hbm [shape: bf16[8,2,128], index: 0, kind: input, shape index: {}]   ;;  %s667_s1 = inlined_call_operand.hbm [shape: bf16[32,128], index: 1, kind: input, shape index: {}]   ;;  %s668_s2 = inlined_call_operand.vmem [shape: f32[1,128], index: 2, kind: input, shape index: {}]   ;;  %s669_s3 = inlined_call_operand.hbm [shape: bf16[128,128], index: 3, kind: input, shape index: {}]   ;;  %s670_s4 = inlined_call_operand.vmem [shape: f32[1,128], index: 4, kind: input, shape index: {}]   ;;  %s671_s5 = inlined_call_operand.hbm [shape: f32[8,128], index: 5, kind: output, shape index: {}]  }
   0x1   :  { %11 = vsyncpa [#allocation7], 0 }
   0x2   :  { %12 = vsyncpa [#allocation5], 0  ;;  %s551_s18 = smov [#allocation6]   ;;  %s457_s22 = scalar_lea.hbm %s667_s1, 256 }
   0x3   :  { %s30_s19 = sshll.u32 %s551_s18, 4  ;;  %p458_p0 = scmp.ne.s32.totalorder %s667_s1, %s457_s22  ;;  %s31_s19 = int_to_ptr.vmem [resolvable:$true] %s30_s19 }
   0x4   :  { %p461_p1 = scmp.lt.u32.totalorder %s457_s22, %s667_s1 }
   0x6   :  { %p463_p2 = pnand %p461_p1, %p458_p0 }
   0x8   :  { %466 = shalt.err (!%p463_p2)
}
   0x9   :  { %s467_s27 = scalar_lea.vmem %s31_s19, 256  ;;  %p472_p4 = scmp.lt.s32.totalorder %s31_s19, %s31_s19 }
   0xa   :  { %p468_p3 = scmp.ne.s32.totalorder %s31_s19, %s467_s27  ;;  %p473_p5 = scmp.lt.s32.totalorder %s467_s27, %s467_s27 }
   0xc   :  { %p474_p6 = por %p473_p5, %p472_p4 }
   0xe   :  { %p475_p7 = pnand %p474_p6, %p468_p3 }
  0x10   :  { %478 = shalt.err (!%p475_p7)
}
  0x11   :  { %s552_s28 = smov 64   ;;  %s553_s29 = smov 4  }
  0x12   :  { %36 = dma.hbm_to_vmem [thread:$0]  %s667_s1, 256, %s31_s19, [#allocation7], %s552_s28, %s552_s28, %s553_s29  }
  0x13   :  { %s554_s7 = smov [#allocation3]   ;;  %s479_s11 = scalar_lea.hbm %s666_s0, 128 }
  0x14   :  { %s18_s8 = sshll.u32 %s554_s7, 4  ;;  %p480_p8 = scmp.ne.s32.totalorder %s666_s0, %s479_s11  ;;  %s19_s8 = int_to_ptr.vmem [resolvable:$true] %s18_s8 }
  0x15   :  { %p483_p9 = scmp.lt.u32.totalorder %s479_s11, %s666_s0 }
  0x17   :  { %p485_p10 = pnand %p483_p9, %p480_p8 }
  0x19   :  { %488 = shalt.err (!%p485_p10)
}
  0x1a   :  { %s489_s16 = scalar_lea.vmem %s19_s8, 128  ;;  %p494_p12 = scmp.lt.s32.totalorder %s19_s8, %s19_s8 }
  0x1b   :  { %p490_p11 = scmp.ne.s32.totalorder %s19_s8, %s489_s16  ;;  %p495_p13 = scmp.lt.s32.totalorder %s489_s16, %s489_s16 }
  0x1d   :  { %p496_p0 = por %p495_p13, %p494_p12 }
  0x1f   :  { %p497_p1 = pnand %p496_p0, %p490_p11 }
  0x21   :  { %500 = shalt.err (!%p497_p1)
}
  0x22   :  { %s555_s1 = smov 16   ;;  %s556_s17 = smov 1  }
  0x23   :  { %24 = dma.hbm_to_vmem [thread:$0]  %s666_s0, 128, %s19_s8, [#allocation4], %s555_s1, %s555_s1, %s556_s17  }
  0x24   :  { %s557_s20 = smov [#allocation8]   ;;  %s501_s24 = scalar_lea.hbm %s669_s3, 1024 }
  0x25   :  { %s44_s21 = sshll.u32 %s557_s20, 4  ;;  %p502_p2 = scmp.ne.s32.totalorder %s669_s3, %s501_s24  ;;  %s45_s21 = int_to_ptr.vmem [resolvable:$true] %s44_s21 }
  0x26   :  { %p505_p3 = scmp.lt.u32.totalorder %s501_s24, %s669_s3 }
  0x28   :  { %p507_p4 = pnand %p505_p3, %p502_p2 }
  0x2a   :  { %510 = shalt.err (!%p507_p4)
}
  0x2b   :  { %s511_s6 = scalar_lea.vmem %s45_s21, 1024  ;;  %p516_p6 = scmp.lt.s32.totalorder %s45_s21, %s45_s21 }
  0x2c   :  { %p512_p5 = scmp.ne.s32.totalorder %s45_s21, %s511_s6  ;;  %p517_p7 = scmp.lt.s32.totalorder %s511_s6, %s511_s6 }
  0x2e   :  { %p518_p8 = por %p517_p7, %p516_p6 }
  0x30   :  { %p519_p9 = pnand %p518_p8, %p512_p5 }
  0x32   :  { %522 = shalt.err (!%p519_p9)
}
  0x33   :  { %50 = dma.hbm_to_vmem [thread:$0]  %s669_s3, 1024, %s45_s21, [#allocation7], %s552_s28, %s552_s28, %s553_s29  }
  0x34   :  { %545 = dma.done.wait [#allocation4], 128  }
  0x35   :  { %546 = vsyncadd [#allocation4], 4294967168 }
  0x36   :  { %547 = dma.done.wait [#allocation7], 1280  }
  0x37   :  { %548 = vsyncadd [#allocation7], 4294966016  ;;  %vm85_vm0 = vcmask 1041408   ;;  %v68_v0 = vld [vmem:[#allocation3] sm:$0x1]  ;;  %vm150_vm1 = vcmask 1041409  }
  0x38   :  { %v69_v1 = vld [vmem:[#allocation3 + $0x1] sm:$0x1]  ;;  %v70_v2 = vld [vmem:[#allocation3 + $0x2] sm:$0x1]  ;;  %v71_v3 = vld [vmem:[#allocation3 + $0x3] sm:$0x1]  ;;  %v76_v6 = vunpack.c.l.bf16 %v68_v0 }
  0x39   :  { %v72_v4 = vld [vmem:[#allocation3 + $0x4] sm:$0x1]  ;;  %v73_v5 = vld [vmem:[#allocation3 + $0x5] sm:$0x1]  ;;  %v77_v7 = vunpack.c.l.bf16 %v69_v1  ;;  %v78_v8 = vunpack.c.l.bf16 %v70_v2  ;;  %v74_v9 = vld [vmem:[#allocation3 + $0x6] sm:$0x1]  ;;  %v79_v11 = vunpack.c.l.bf16 %v71_v3 }
  0x3a   :  { %v75_v10 = vld [vmem:[#allocation3 + $0x7] sm:$0x1]  ;;  %v80_v12 = vunpack.c.l.bf16 %v72_v4  ;;  %v81_v13 = vunpack.c.l.bf16 %v73_v5  ;;  %v82_v14 = vunpack.c.l.bf16 %v74_v9  ;;  %v86_v16 = vsel %vm85_vm0, %v76_v6, -inf  ;;  %v447_v62 = vld [vmem:[#allocation6] sm:$0xff]   ;;  %s560_s3 = smov 96   ;;  %s561_s29 = smov 32  }
  0x3b   :  { %v83_v15 = vunpack.c.l.bf16 %v75_v10  ;;  %v93_v17 = vsel %vm85_vm0, %v77_v7, -inf  ;;  %v87_v18 = vrot.slane %v86_v16, 4  ;;  %v100_v20 = vsel %vm85_vm0, %v78_v8, -inf  ;;  %s562_s11 = smov [#allocation9]  }
  0x3c   :  { %v94_v19 = vrot.slane %v93_v17, 4  ;;  %v107_v21 = vsel %vm85_vm0, %v79_v11, -inf  ;;  %v101_v22 = vrot.slane %v100_v20, 4  ;;  %v114_v24 = vsel %vm85_vm0, %v80_v12, -inf  ;;  %v448_v11 = vld [vmem:[#allocation6 + $0x8] sm:$0xff]   ;;  %s372_s12 = sshll.u32 %s562_s11, 4  ;;  %s373_s12 = int_to_ptr.vmem [resolvable:$true] %s372_s12 }
  0x3d   :  { %v108_v23 = vrot.slane %v107_v21, 4  ;;  %v121_v25 = vsel %vm85_vm0, %v81_v13, -inf  ;;  %v88_v26 = vmax.f32 %v86_v16, %v87_v18  ;;  %v115_v28 = vrot.slane %v114_v24, 4  ;;  %v449_v16 = vld [vmem:[#allocation8] sm:$0xff]   ;;  %p528_p11 = scmp.lt.s32.totalorder %s373_s12, %s373_s12 }
  0x3e   :  { %v95_v27 = vmax.f32 %v93_v17, %v94_v19  ;;  %v122_v29 = vrot.slane %v121_v25, 4  ;;  %vm152_vm2 = vcmask 1042434   ;;  %v102_v30 = vmax.f32 %v100_v20, %v101_v22  ;;  %v450_v19 = vld [vmem:[#allocation8 + $0x8] sm:$0xff]   ;;  %v451_v20 = vld [vmem:[#allocation8 + $0x10] sm:$0xff]   ;;  %v453_v22 = vld [vmem:[#allocation8 + $0x20] sm:$0xff]  }
  0x3f   :  { %v109_v31 = vmax.f32 %v107_v21, %v108_v23  ;;  %v128_v32 = vsel %vm85_vm0, %v82_v14, -inf  ;;  %v135_v33 = vsel %vm85_vm0, %v83_v15, -inf  ;;  %vm154_vm3 = vcmask 1043459   ;;  %v452_v21 = vld [vmem:[#allocation8 + $0x18] sm:$0xff]   ;;  %v454_v23 = vld [vmem:[#allocation8 + $0x28] sm:$0xff]  }
  0x40   :  { %v89_v34 = vrot.slane %v88_v26, 2  ;;  %v96_v35 = vrot.slane %v95_v27, 2  ;;  %v116_v36 = vmax.f32 %v114_v24, %v115_v28  ;;  %v123_v37 = vmax.f32 %v121_v25, %v122_v29 }
  0x41   :  { %vm156_vm4 = vcmask 1044484   ;;  %v103_v38 = vrot.slane %v102_v30, 2  ;;  %v110_v39 = vrot.slane %v109_v31, 2  ;;  %v129_v40 = vrot.slane %v128_v32, 4 }
  0x42   :  { %v136_v41 = vrot.slane %v135_v33, 4  ;;  %v90_v42 = vmax.f32 %v88_v26, %v89_v34  ;;  %v97_v43 = vmax.f32 %v95_v27, %v96_v35  ;;  %v117_v44 = vrot.slane %v116_v36, 2 }
  0x43   :  { %v124_v45 = vrot.slane %v123_v37, 2  ;;  %v104_v46 = vmax.f32 %v102_v30, %v103_v38  ;;  %v111_v47 = vmax.f32 %v109_v31, %v110_v39  ;;  %v130_v48 = vmax.f32 %v128_v32, %v129_v40  ;;  %v455_v31 = vld [vmem:[#allocation8 + $0x30] sm:$0xff]   ;;  %v456_v32 = vld [vmem:[#allocation8 + $0x38] sm:$0xff]  }
  0x44   :  { %v137_v49 = vmax.f32 %v135_v33, %v136_v41  ;;  %v91_v50 = vrot.slane %v90_v42, 1  ;;  %v98_v51 = vrot.slane %v97_v43, 1  ;;  %v118_v52 = vmax.f32 %v116_v36, %v117_v44  ;;  %v382_v33 = vld [vmem:[%s668_s2] ss:$0 sm:$0xff]  ;;  %s523_s2 = scalar_lea.vmem %s373_s12, 128 }
  0x45   :  { %v125_v53 = vmax.f32 %v123_v37, %v124_v45  ;;  %v105_v54 = vrot.slane %v104_v46, 1  ;;  %v112_v55 = vrot.slane %v111_v47, 1  ;;  %v131_v56 = vrot.slane %v130_v48, 2  ;;  %v386_v41 = vld [vmem:[%s670_s4] ss:$0 sm:$0xff]  ;;  %p524_p10 = scmp.ne.s32.totalorder %s373_s12, %s523_s2  ;;  %p529_p12 = scmp.lt.s32.totalorder %s523_s2, %s523_s2 }
  0x46   :  { %v138_v57 = vrot.slane %v137_v49, 2  ;;  %v92_v58 = vmax.f32 %v90_v42, %v91_v50  ;;  %v99_v59 = vmax.f32 %v97_v43, %v98_v51  ;;  %v119_v60 = vrot.slane %v118_v52, 1 }
  0x47   :  { %v126_v61 = vrot.slane %v125_v53, 1  ;;  %v106_v63 = vmax.f32 %v104_v46, %v105_v54  ;;  %v113_v0 = vmax.f32 %v111_v47, %v112_v55  ;;  %v132_v1 = vmax.f32 %v130_v48, %v131_v56  ;;  %p530_p13 = por %p529_p12, %p528_p11 }
  0x48   :  { %v139_v2 = vmax.f32 %v137_v49, %v138_v57  ;;  %v120_v3 = vmax.f32 %v118_v52, %v119_v60  ;;  %v151_v5 = vsel %vm150_vm1, %v99_v59, %v92_v58  ;;  %vm158_vm5 = vcmask 1045509  }
  0x49   :  { %v127_v4 = vmax.f32 %v125_v53, %v126_v61  ;;  %v133_v6 = vrot.slane %v132_v1, 1  ;;  %v153_v8 = vsel %vm152_vm2, %v106_v63, %v151_v5  ;;  %v558_v9 = vmov 0.0   ;;  %p531_p0 = pnand %p530_p13, %p524_p10 }
  0x4a   :  { %v140_v7 = vrot.slane %v139_v2, 1  ;;  %407 = vmatprep.subr.bf16.mxu0 %v558_v9  ;;  %415 = vmatprep.subr.bf16.mxu1 %v558_v9  ;;  %v155_v10 = vsel %vm154_vm3, %v113_v0, %v153_v8  ;;  %vm160_vm6 = vcmask 1046534   ;;  %vm162_vm7 = vcmask 1047559  }
  0x4b   :  { %408 = vmatpush3.bf16.msra.mxu0 %v447_v62  ;;  %v134_v12 = vmax.f32 %v132_v1, %v133_v6  ;;  %v157_v14 = vsel %vm156_vm4, %v120_v3, %v155_v10  ;;  %vm559_vm8 = vmmov 0   ;;  %416 = vmatpush3.bf16.msra.mxu1 %v449_v16  ;;  %vm208_vm9 = vcmask 261120  }
  0x4c   :  { %v141_v13 = vmax.f32 %v139_v2, %v140_v7  ;;  %409 = vmatprep.subr.bf16.mxu0 %v558_v9  ;;  %411 = vmatprep.mubr.msk.bf16.mxu0 %vm559_vm8, %v558_v9  ;;  %v159_v15 = vsel %vm158_vm5, %v127_v4, %v157_v14 }
  0x4d   :  { %431 = vmatprep.mubr.msk.bf16.mxu1 %vm559_vm8, %v558_v9  ;;  %v161_v17 = vsel %vm160_vm6, %v134_v12, %v159_v15  ;;  %417 = vmatprep.subr.bf16.mxu1 %v558_v9 }
  0x4e   :  { %v163_v18 = vsel %vm162_vm7, %v141_v13, %v161_v17 }
  0x4f   :  { %410 = vmatpush3.bf16.msra.mxu0 %v448_v11  ;;  %172 = vrot.lane.b32.xlu0 %v163_v18, %s560_s3 }
  0x50   :  { %180 = vrot.lane.b32.xlu1 %v163_v18, %s561_s29  ;;  %418 = vmatpush3.bf16.msra.mxu1 %v450_v19 }
  0x51   :  { %419 = vmatprep.subr.bf16.mxu1 %v558_v9 }
  0x53   :  { %176 = vrot.lane.b32.xlu0 %v163_v18, %s552_s28 }
  0x54   :  { %420 = vmatpush3.bf16.msra.mxu1 %v451_v20 }
  0x55   :  { %421 = vmatprep.subr.bf16.mxu1 %v558_v9 }
  0x58   :  { %422 = vmatpush3.bf16.msra.mxu1 %v452_v21 }
  0x59   :  { %423 = vmatprep.subr.bf16.mxu1 %v558_v9 }
  0x5c   :  { %424 = vmatpush3.bf16.msra.mxu1 %v453_v22 }
  0x5d   :  { %425 = vmatprep.subr.bf16.mxu1 %v558_v9 }
  0x60   :  { %426 = vmatpush3.bf16.msra.mxu1 %v454_v23 }
  0x61   :  { %427 = vmatprep.subr.bf16.mxu1 %v558_v9 }
  0x64   :  { %428 = vmatpush3.bf16.msra.mxu1 %v455_v31 }
  0x65   :  { %429 = vmatprep.subr.bf16.mxu1 %v558_v9 }
  0x68   :  { %430 = vmatpush3.bf16.msra.mxu1 %v456_v32 }
  0xc1   :  { %v173_v24 = vpop.permute.xlu0 %172 }
  0xc2   :  { %v175_v25 = vmax.f32 %v163_v18, %v173_v24  ;;  %v181_v27 = vpop.permute.xlu1 %180 }
  0xc5   :  { %v177_v26 = vpop.permute.xlu0 %176 }
  0xc6   :  { %v179_v28 = vmax.f32 %v175_v25, %v177_v26 }
  0xc8   :  { %v183_v29 = vmax.f32 %v179_v28, %v181_v27 }
  0xca   :  { %v184_v30 = vpack.c.bf16 %v183_v29, %v183_v29 }
  0xcc   :  { %412 = vmatmul.mubr.msk.bf16.vlgmr.msra.gmra.mrb[0].mxu0 %vm208_vm9, %v184_v30 }
 0x19f   :  { %v246_v34 = vpop.f32.mrb[0].mxu0 }
 0x1a0   :  { %v247_v35 = vadd.f32 %v382_v33, %v246_v34  ;;  %v413_v36 = vpop.f32.mrb[1].mxu0 }
 0x1a1   :  { %v249_v37 = vpop.f32.mrb[2].mxu0 }
 0x1a2   :  { %v252_v38 = vmax.f32 %v247_v35, 0.0  ;;  %v414_v39 = vpop.f32.mrb[3].mxu0 }
 0x1a4   :  { %v253_v40 = vpack.c.bf16 %v252_v38, %v252_v38 }
 0x1a6   :  { %432 = vmatmul.mubr.bf16.vlgmr.msra.gmra.mrb[0].mxu1 %v253_v40 }
 0x279   :  { %v359_v42 = vpop.f32.mrb[0].mxu1 }
 0x27a   :  { %v360_v43 = vadd.f32 %v386_v41, %v359_v42  ;;  %v433_v44 = vpop.f32.mrb[1].mxu1 }
 0x27b   :  { %v362_v45 = vpop.f32.mrb[2].mxu1 }
 0x27c   :  { %365 = vst [vmem:[#allocation9] sm:$0xff] %v360_v43  ;;  %v434_v46 = vpop.f32.mrb[3].mxu1 }
 0x27d   :  { %534 = shalt.err (!%p531_p0)
}
 0x27e   :  { %s535_s4 = scalar_lea.hbm %s671_s5, 128 }
 0x27f   :  { %p536_p1 = scmp.ne.s32.totalorder %s671_s5, %s535_s4  ;;  %p539_p2 = scmp.lt.u32.totalorder %s535_s4, %s671_s5 }
 0x281   :  { %p541_p3 = pnand %p539_p2, %p536_p1 }
 0x283   :  { %544 = shalt.err (!%p541_p3)
}
 0x284   :  { %375 = dma.vmem_to_hbm [thread:$0]  %s373_s12, 128, %s671_s5, [#allocation5]  }
 0x285   :  { %549 = dma.done.wait [#allocation5], 128  }
 0x286   :  { %550 = vsyncadd [#allocation5], 4294967168 }
 0x287   :  { %379 = vsyncpa [#allocation4], 1 }
 0x288   :  { %380 = vsyncpa [#allocation7], 1 }
 0x289   :  { %381 = vsyncpa [#allocation5], 1 }

</bundles_post_ra>
